<compile_context>
chip_gen: v6e
topology: v6e:2x2x1
jax: 0.10.0
libtpu: 0.0.40
codegen_flags: <defaults>
</compile_context>

<pallas_src>
import functools

import jax
import jax.numpy as jnp
from jax.experimental import pallas as pl
from jax.experimental.pallas import tpu as pltpu


def _round_up(n, m):
    return ((n + m - 1) // m) * m


def _leaky_relu(x, negative_slope=0.01):
    # max-form: mul + max (VPU) instead of cmp + select.
    return jnp.maximum(x, negative_slope * x)


def _critic_kernel(xu_ref, w1_ref, b1_ref, w2_ref, b2_ref, w3r_ref, b3_ref,
                   g1_ref, be1_ref, g2_ref, be2_ref, o_ref,
                   *, layer_norm: bool, inv_n1: float, inv_n2: float):
    xu = xu_ref[...]                                   # [TB, K1p] bf16

    # L1: fused cat([x,u]) @ W1 as one lane-padded matmul, f32 accumulate.
    h1 = jnp.dot(xu, w1_ref[...],
                 preferred_element_type=jnp.float32) + b1_ref[...]
    if layer_norm:
        # Stats over the TRUE 400 features (pad columns are exactly zero).
        mu = jnp.sum(h1, axis=-1, keepdims=True) * inv_n1
        ex2 = jnp.sum(h1 * h1, axis=-1, keepdims=True) * inv_n1
        var = ex2 - mu * mu
        h1 = (h1 - mu) * jax.lax.rsqrt(var + 1e-5) * g1_ref[...] + be1_ref[...]
    h1 = _leaky_relu(h1)

    # L2: 512 -> 384 (padded), bf16 MXU inputs, f32 accumulate.
    h2 = jnp.dot(h1.astype(w2_ref.dtype), w2_ref[...],
                 preferred_element_type=jnp.float32) + b2_ref[...]
    if layer_norm:
        mu = jnp.sum(h2, axis=-1, keepdims=True) * inv_n2
        ex2 = jnp.sum(h2 * h2, axis=-1, keepdims=True) * inv_n2
        var = ex2 - mu * mu
        h2 = (h2 - mu) * jax.lax.rsqrt(var + 1e-5) * g2_ref[...] + be2_ref[...]
    h2 = _leaky_relu(h2)

    # L3: 300->1 projection as VPU multiply + XLU lane reduce (MXU stays free).
    q = jnp.sum(h2 * w3r_ref[...], axis=-1, keepdims=True) + b3_ref[...]
    o_ref[...] = q.astype(o_ref.dtype)


def critic_forward(x, u, params, *, layer_norm=False, batch_tile=256):
    """x: [B, state_dim], u: [B, action_dim] -> q: [B, 1] (float32)."""
    B, sd = x.shape
    ad = u.shape[1]
    K1 = sd + ad
    w1, b1 = params["w1"], params["b1"]
    w2, b2 = params["w2"], params["b2"]
    w3, b3 = params["w3"], params["b3"]
    g1, be1 = params["g1"], params["be1"]
    g2, be2 = params["g2"], params["be2"]

    K1p = w1.shape[0]
    cdt = w1.dtype

    # Batch tiling: TB is a multiple of 8; pad batch up to a multiple of TB.
    TB = min(batch_tile, _round_up(B, 8))
    Bp = _round_up(B, TB)
    grid = (Bp // TB,)

    # Fuse + zero-pad [x | u] into one lane-aligned slab (layout plumbing done
    # once in the wrapper as a single fused XLA op; pad rows/cols are zero).
    xu = jnp.concatenate([x, u], axis=1).astype(cdt)
    xu = jnp.pad(xu, ((0, Bp - B), (0, K1p - K1)))

    kernel = functools.partial(
        _critic_kernel, layer_norm=layer_norm,
        inv_n1=1.0 / params["n1"], inv_n2=1.0 / params["n2"])

    def resident(arr):
        # Whole-array block, constant index map -> single DMA, stays VMEM-resident.
        return pl.BlockSpec(arr.shape, lambda i: (0, 0))

    in_specs = [
        pl.BlockSpec((TB, K1p), lambda i: (i, 0)),   # xu batch tile (double-buffered)
        resident(w1), resident(b1),
        resident(w2), resident(b2),
        resident(w3), resident(b3),
        resident(g1), resident(be1),
        resident(g2), resident(be2),
    ]

    out = pl.pallas_call(
        kernel,
        out_shape=jax.ShapeDtypeStruct((Bp, 1), jnp.float32),
        grid=grid,
        in_specs=in_specs,
        out_specs=pl.BlockSpec((TB, 1), lambda i: (i, 0)),
        compiler_params=pltpu.CompilerParams(
            dimension_semantics=("parallel",)),
    )(xu, w1, b1, w2, b2, w3, b3, g1, be1, g2, be2)

    return out[:B]


def init_critic_params(key, state_dim, action_dim, *, compute_dtype=jnp.bfloat16):
    """PyTorch nn.Linear-style init (U[-1/sqrt(fan_in), 1/sqrt(fan_in)]),
    stored lane-padded (zeros in the pads); matmul weights in bf16."""
    H1, H2 = 400, 300
    K1 = state_dim + action_dim
    K1p = _round_up(K1, 128)
    H1p = _round_up(H1, 128)   # 512
    H2p = _round_up(H2, 128)   # 384
    ks = jax.random.split(key, 6)

    def uniform(k, shape, fan_in):
        bound = 1.0 / (float(fan_in) ** 0.5)
        return jax.random.uniform(k, shape, jnp.float32, -bound, bound)

    w1 = jnp.zeros((K1p, H1p), jnp.float32).at[:K1, :H1].set(uniform(ks[0], (K1, H1), K1))
    b1 = jnp.zeros((1, H1p), jnp.float32).at[:, :H1].set(uniform(ks[1], (1, H1), K1))
    w2 = jnp.zeros((H1p, H2p), jnp.float32).at[:H1, :H2].set(uniform(ks[2], (H1, H2), H1))
    b2 = jnp.zeros((1, H2p), jnp.float32).at[:, :H2].set(uniform(ks[3], (1, H2), H1))
    w3 = jnp.zeros((1, H2p), jnp.float32).at[:, :H2].set(uniform(ks[4], (1, H2), H2))
    b3 = uniform(ks[5], (1, 1), H2)
    # LayerNorm affine params (PyTorch default gamma=1, beta=0); pad gamma/beta
    # are zero so padded columns stay exactly zero after normalization.
    g1 = jnp.zeros((1, H1p), jnp.float32).at[:, :H1].set(1.0)
    be1 = jnp.zeros((1, H1p), jnp.float32)
    g2 = jnp.zeros((1, H2p), jnp.float32).at[:, :H2].set(1.0)
    be2 = jnp.zeros((1, H2p), jnp.float32)

    return {
        "w1": w1.astype(compute_dtype), "b1": b1,
        "w2": w2.astype(compute_dtype), "b2": b2,
        "w3": w3, "b3": b3,
        "g1": g1, "be1": be1, "g2": g2, "be2": be2,
        "n1": H1, "n2": H2,
    }


def critic_reference(x, u, params, *, layer_norm=False):
    """Pure-JAX reference with identical padded/bf16 math (for correctness check)."""
    cdt = params["w1"].dtype
    B, sd = x.shape
    ad = u.shape[1]
    K1p = params["w1"].shape[0]
    xu = jnp.pad(jnp.concatenate([x, u], axis=1).astype(cdt),
                 ((0, 0), (0, K1p - (sd + ad))))

    h1 = jnp.dot(xu, params["w1"], preferred_element_type=jnp.float32) + params["b1"]
    if layer_norm:
        mu = jnp.sum(h1, -1, keepdims=True) / params["n1"]
        var = jnp.sum(h1 * h1, -1, keepdims=True) / params["n1"] - mu * mu
        h1 = (h1 - mu) * jax.lax.rsqrt(var + 1e-5) * params["g1"] + params["be1"]
    h1 = jnp.maximum(h1, 0.01 * h1)

    h2 = jnp.dot(h1.astype(cdt), params["w2"], preferred_element_type=jnp.float32) + params["b2"]
    if layer_norm:
        mu = jnp.sum(h2, -1, keepdims=True) / params["n2"]
        var = jnp.sum(h2 * h2, -1, keepdims=True) / params["n2"] - mu * mu
        h2 = (h2 - mu) * jax.lax.rsqrt(var + 1e-5) * params["g2"] + params["be2"]
    h2 = jnp.maximum(h2, 0.01 * h2)

    return jnp.sum(h2 * params["w3"], -1, keepdims=True) + params["b3"]


# TODO(synk): RLNN's set_params/get_params/get_grads/save/load are host-side
# parameter (de)serialization utilities, not kernel work; not translated.

if __name__ == "__main__":
    key = jax.random.PRNGKey(0)
    k_x, k_u, k_p = jax.random.split(key, 3)

    batch, state_dim, action_dim = 2, 16, 4
    x = jax.random.normal(k_x, (batch, state_dim), jnp.float32)
    u = jax.random.normal(k_u, (batch, action_dim), jnp.float32)
    params = init_critic_params(k_p, state_dim, action_dim)

    # layer_norm=False (module default)
    q = critic_forward(x, u, params, layer_norm=False)
    q = jax.block_until_ready(q)
    q_ref = critic_reference(x, u, params, layer_norm=False)
    assert q.shape == (batch, 1)
    assert jnp.allclose(q, q_ref, atol=2e-3, rtol=2e-3), (q, q_ref)

    # layer_norm=True path
    q_ln = critic_forward(x, u, params, layer_norm=True)
    q_ln = jax.block_until_ready(q_ln)
    q_ln_ref = critic_reference(x, u, params, layer_norm=True)
    assert q_ln.shape == (batch, 1)
    assert jnp.allclose(q_ln, q_ln_ref, atol=2e-3, rtol=2e-3), (q_ln, q_ln_ref)

    print("KERNEL_OK")
</pallas_src>

<mosaic_0001>
module attributes {stable_mosaic.version = 11 : i64} {
  func.func @_critic_kernel(%arg0: i32, %arg1: memref<8x128xbf16, #tpu.memory_space<vmem>>, %arg2: memref<128x512xbf16, #tpu.memory_space<vmem>>, %arg3: memref<1x512xf32, #tpu.memory_space<vmem>>, %arg4: memref<512x384xbf16, #tpu.memory_space<vmem>>, %arg5: memref<1x384xf32, #tpu.memory_space<vmem>>, %arg6: memref<1x384xf32, #tpu.memory_space<vmem>>, %arg7: memref<1x1xf32, #tpu.memory_space<vmem>>, %arg8: memref<1x512xf32, #tpu.memory_space<vmem>>, %arg9: memref<1x512xf32, #tpu.memory_space<vmem>>, %arg10: memref<1x384xf32, #tpu.memory_space<vmem>>, %arg11: memref<1x384xf32, #tpu.memory_space<vmem>>, %arg12: memref<8x1xf32, #tpu.memory_space<vmem>>) attributes {dimension_semantics = [#tpu.dimension_semantics<parallel>], iteration_bounds = array<i64: 1>, scalar_prefetch = 0 : i64, scratch_operands = 0 : i64, tpu.core_type = #tpu.core_type<tc>, window_params = [{transform_indices = @transform_0, window_bounds = array<i64: 8, 128>}, {pipeline_mode = #tpu.pipeline_mode<synchronous>, transform_indices = @transform_1, window_bounds = array<i64: 128, 512>}, {pipeline_mode = #tpu.pipeline_mode<synchronous>, transform_indices = @transform_2, window_bounds = array<i64: 1, 512>}, {pipeline_mode = #tpu.pipeline_mode<synchronous>, transform_indices = @transform_3, window_bounds = array<i64: 512, 384>}, {pipeline_mode = #tpu.pipeline_mode<synchronous>, transform_indices = @transform_4, window_bounds = array<i64: 1, 384>}, {pipeline_mode = #tpu.pipeline_mode<synchronous>, transform_indices = @transform_5, window_bounds = array<i64: 1, 384>}, {pipeline_mode = #tpu.pipeline_mode<synchronous>, transform_indices = @transform_6, window_bounds = array<i64: 1, 1>}, {pipeline_mode = #tpu.pipeline_mode<synchronous>, transform_indices = @transform_7, window_bounds = array<i64: 1, 512>}, {pipeline_mode = #tpu.pipeline_mode<synchronous>, transform_indices = @transform_8, window_bounds = array<i64: 1, 512>}, {pipeline_mode = #tpu.pipeline_mode<synchronous>, transform_indices = @transform_9, window_bounds = array<i64: 1, 384>}, {pipeline_mode = #tpu.pipeline_mode<synchronous>, transform_indices = @transform_10, window_bounds = array<i64: 1, 384>}, {transform_indices = @transform_11, window_bounds = array<i64: 8, 1>}]} {
    %c0 = arith.constant 0 : index
    %c0_0 = arith.constant 0 : index
    %0 = vector.load %arg1[%c0, %c0_0] : memref<8x128xbf16, #tpu.memory_space<vmem>>, vector<8x128xbf16>
    %c0_1 = arith.constant 0 : index
    %c0_2 = arith.constant 0 : index
    %1 = vector.load %arg2[%c0_1, %c0_2] : memref<128x512xbf16, #tpu.memory_space<vmem>>, vector<128x512xbf16>
    %cst = arith.constant dense<0.000000e+00> : vector<8x512xf32>
    %2 = tpu.matmul %0, %1, %cst {dimension_numbers = #tpu.dot_dimension_numbers<[1], [0], [0], [1], [0, 0, 1, 1], [], []>} : vector<8x128xbf16>, vector<128x512xbf16>, vector<8x512xf32> -> vector<8x512xf32>
    %c0_3 = arith.constant 0 : index
    %c0_4 = arith.constant 0 : index
    %3 = vector.load %arg3[%c0_3, %c0_4] : memref<1x512xf32, #tpu.memory_space<vmem>>, vector<1x512xf32>
    %4 = vector.broadcast %3 : vector<1x512xf32> to vector<8x512xf32>
    %5 = arith.addf %2, %4 : vector<8x512xf32>
    %cst_5 = arith.constant 0.00999999977 : f32
    %6 = vector.broadcast %cst_5 : f32 to vector<8x512xf32>
    %7 = arith.mulf %6, %5 : vector<8x512xf32>
    %8 = arith.maximumf %5, %7 : vector<8x512xf32>
    %9 = arith.truncf %8 : vector<8x512xf32> to vector<8x512xbf16>
    %c0_6 = arith.constant 0 : index
    %c0_7 = arith.constant 0 : index
    %10 = vector.load %arg4[%c0_6, %c0_7] : memref<512x384xbf16, #tpu.memory_space<vmem>>, vector<512x384xbf16>
    %cst_8 = arith.constant dense<0.000000e+00> : vector<8x384xf32>
    %11 = tpu.matmul %9, %10, %cst_8 {dimension_numbers = #tpu.dot_dimension_numbers<[1], [0], [0], [1], [0, 0, 1, 1], [], []>} : vector<8x512xbf16>, vector<512x384xbf16>, vector<8x384xf32> -> vector<8x384xf32>
    %c0_9 = arith.constant 0 : index
    %c0_10 = arith.constant 0 : index
    %12 = vector.load %arg5[%c0_9, %c0_10] : memref<1x384xf32, #tpu.memory_space<vmem>>, vector<1x384xf32>
    %13 = vector.broadcast %12 : vector<1x384xf32> to vector<8x384xf32>
    %14 = arith.addf %11, %13 : vector<8x384xf32>
    %cst_11 = arith.constant 0.00999999977 : f32
    %15 = vector.broadcast %cst_11 : f32 to vector<8x384xf32>
    %16 = arith.mulf %15, %14 : vector<8x384xf32>
    %17 = arith.maximumf %14, %16 : vector<8x384xf32>
    %c0_12 = arith.constant 0 : index
    %c0_13 = arith.constant 0 : index
    %18 = vector.load %arg6[%c0_12, %c0_13] : memref<1x384xf32, #tpu.memory_space<vmem>>, vector<1x384xf32>
    %19 = vector.broadcast %18 : vector<1x384xf32> to vector<8x384xf32>
    %20 = arith.mulf %17, %19 : vector<8x384xf32>
    %cst_14 = arith.constant dense<0.000000e+00> : vector<8xf32>
    %21 = vector.multi_reduction <add>, %20, %cst_14 [1] : vector<8x384xf32> to vector<8xf32>
    %22 = vector.shape_cast %21 : vector<8xf32> to vector<8x1xf32>
    %c0_15 = arith.constant 0 : index
    %c0_16 = arith.constant 0 : index
    %23 = vector.load %arg7[%c0_15, %c0_16] : memref<1x1xf32, #tpu.memory_space<vmem>>, vector<1x1xf32>
    %24 = vector.broadcast %23 : vector<1x1xf32> to vector<8x1xf32>
    %25 = arith.addf %22, %24 : vector<8x1xf32>
    %c0_17 = arith.constant 0 : index
    %c0_18 = arith.constant 0 : index
    %26 = vector.load %arg12[%c0_17, %c0_18] : memref<8x1xf32, #tpu.memory_space<vmem>>, vector<8x1xf32>
    tpu.vector_store %arg12[%c0_17, %c0_18], %25 {strides = array<i32>} : memref<8x1xf32, #tpu.memory_space<vmem>>, vector<8x1xf32>,
    return
  }
  func.func @transform_0(%arg0: i32) -> (i32, i32) {
    %c0_i32 = arith.constant 0 : i32
    %c0_i32_0 = arith.constant 0 : i32
    return %arg0, %c0_i32 : i32, i32
  }
  func.func @transform_1(%arg0: i32) -> (i32, i32) {
    %c0_i32 = arith.constant 0 : i32
    %c0_i32_0 = arith.constant 0 : i32
    %c0_i32_1 = arith.constant 0 : i32
    return %c0_i32, %c0_i32_0 : i32, i32
  }
  func.func @transform_2(%arg0: i32) -> (i32, i32) {
    %c0_i32 = arith.constant 0 : i32
    %c0_i32_0 = arith.constant 0 : i32
    %c0_i32_1 = arith.constant 0 : i32
    return %c0_i32, %c0_i32_0 : i32, i32
  }
  func.func @transform_3(%arg0: i32) -> (i32, i32) {
    %c0_i32 = arith.constant 0 : i32
    %c0_i32_0 = arith.constant 0 : i32
    %c0_i32_1 = arith.constant 0 : i32
    return %c0_i32, %c0_i32_0 : i32, i32
  }
  func.func @transform_4(%arg0: i32) -> (i32, i32) {
    %c0_i32 = arith.constant 0 : i32
    %c0_i32_0 = arith.constant 0 : i32
    %c0_i32_1 = arith.constant 0 : i32
    return %c0_i32, %c0_i32_0 : i32, i32
  }
  func.func @transform_5(%arg0: i32) -> (i32, i32) {
    %c0_i32 = arith.constant 0 : i32
    %c0_i32_0 = arith.constant 0 : i32
    %c0_i32_1 = arith.constant 0 : i32
    return %c0_i32, %c0_i32_0 : i32, i32
  }
  func.func @transform_6(%arg0: i32) -> (i32, i32) {
    %c0_i32 = arith.constant 0 : i32
    %c0_i32_0 = arith.constant 0 : i32
    %c0_i32_1 = arith.constant 0 : i32
    return %c0_i32, %c0_i32_0 : i32, i32
  }
  func.func @transform_7(%arg0: i32) -> (i32, i32) {
    %c0_i32 = arith.constant 0 : i32
    %c0_i32_0 = arith.constant 0 : i32
    %c0_i32_1 = arith.constant 0 : i32
    return %c0_i32, %c0_i32_0 : i32, i32
  }
  func.func @transform_8(%arg0: i32) -> (i32, i32) {
    %c0_i32 = arith.constant 0 : i32
    %c0_i32_0 = arith.constant 0 : i32
    %c0_i32_1 = arith.constant 0 : i32
    return %c0_i32, %c0_i32_0 : i32, i32
  }
  func.func @transform_9(%arg0: i32) -> (i32, i32) {
    %c0_i32 = arith.constant 0 : i32
    %c0_i32_0 = arith.constant 0 : i32
    %c0_i32_1 = arith.constant 0 : i32
    return %c0_i32, %c0_i32_0 : i32, i32
  }
  func.func @transform_10(%arg0: i32) -> (i32, i32) {
    %c0_i32 = arith.constant 0 : i32
    %c0_i32_0 = arith.constant 0 : i32
    %c0_i32_1 = arith.constant 0 : i32
    return %c0_i32, %c0_i32_0 : i32, i32
  }
  func.func @transform_11(%arg0: i32) -> (i32, i32) {
    %c0_i32 = arith.constant 0 : i32
    %c0_i32_0 = arith.constant 0 : i32
    return %arg0, %c0_i32 : i32, i32
  }
}

</mosaic_0001>

<bundles_post_ra>
// kernel: tpu_custom_call.1
= control target key start
LH: loop header
LB: loop body
LE: loop exit
PB: predicated region body
PF: predicated region fallthrough
CT: control target
= control target key end

     0   :  { %s1860_s0 = inlined_call_operand.hbm [shape: bf16[8,128], index: 0, kind: input, shape index: {}]   ;;  %s1861_s1 = inlined_call_operand.hbm [shape: bf16[128,512], index: 1, kind: input, shape index: {}]   ;;  %s1862_s2 = inlined_call_operand.vmem [shape: f32[1,512], index: 2, kind: input, shape index: {}]   ;;  %s1863_s3 = inlined_call_operand.hbm [shape: bf16[512,384], index: 3, kind: input, shape index: {}]   ;;  %s1864_s4 = inlined_call_operand.hbm [shape: f32[1,384], index: 4, kind: input, shape index: {}]   ;;  %s1865_s5 = inlined_call_operand.hbm [shape: f32[1,384], index: 5, kind: input, shape index: {}]   ;;  %s1866_s6 = inlined_call_operand.<no memory space> [shape: f32[1,1], index: 6, kind: input, shape index: {}]   ;;  %s1867_s7 = inlined_call_operand.vmem [shape: f32[1,512], index: 7, kind: input, shape index: {}]   ;;  %s1868_s8 = inlined_call_operand.vmem [shape: f32[1,512], index: 8, kind: input, shape index: {}]   ;;  %s1869_s9 = inlined_call_operand.vmem [shape: f32[1,384], index: 9, kind: input, shape index: {}]   ;;  %s1870_s10 = inlined_call_operand.vmem [shape: f32[1,384], index: 10, kind: input, shape index: {}]   ;;  %s1871_s11 = inlined_call_operand.vmem [shape: f32[8,1], index: 11, kind: output, shape index: {}]  }
   0x1   :  { %v16_v0 = vstv %s1866_s6 }
   0x2   :  { %17 = vst [vmem:[#allocation2] sm:$0x1] %v16_v0 }
   0x3   :  { %18 = vsyncpa [#allocation4], 0 }
   0x4   :  { %19 = vsyncpa [#allocation6], 0 }
   0x5   :  { %20 = vsyncpa [#allocation9], 0  ;;  %s1743_s7 = smov [#allocation5]  }
   0x6   :  { %s36_s19 = sshll.u32 %s1743_s7, 4  ;;  %s37_s19 = int_to_ptr.vmem [resolvable:$true] %s36_s19 }
   0x7   :  { %s1645_s8 = scalar_lea.vmem %s37_s19, 4096  ;;  %p1650_p1 = scmp.lt.s32.totalorder %s37_s19, %s37_s19 }
   0x8   :  { %p1646_p0 = scmp.ne.s32.totalorder %s37_s19, %s1645_s8  ;;  %p1651_p2 = scmp.lt.s32.totalorder %s1645_s8, %s1645_s8 }
   0xa   :  { %p1652_p3 = por %p1651_p2, %p1650_p1 }
   0xc   :  { %p1653_p4 = pnand %p1652_p3, %p1646_p0 }
   0xe   :  { %1656 = shalt.err (!%p1653_p4)
}
   0xf   :  { %s1744_s9 = smov 256   ;;  %s1745_s10 = smov 16  }
  0x10   :  { %42 = dma.hbm_to_vmem [thread:$0]  %s1861_s1, 4096, %s37_s19, [#allocation6], %s1744_s9, %s1744_s9, %s1745_s10  }
  0x11   :  { %s1746_s6 = smov [#allocation8]   ;;  %s1747_s23 = smov [#allocation3]  }
  0x12   :  { %s63_s22 = sshll.u32 %s1746_s6, 4  ;;  %s27_s24 = sshll.u32 %s1747_s23, 4  ;;  %s64_s22 = int_to_ptr.vmem [resolvable:$true] %s63_s22  ;;  %s28_s24 = int_to_ptr.vmem [resolvable:$true] %s27_s24 }
  0x13   :  { %s1665_s25 = scalar_lea.vmem %s64_s22, 48  ;;  %s1669_s26 = scalar_lea.vmem %s64_s22, 64 }
  0x14   :  { %p1666_p5 = scmp.ne.s32.totalorder %s64_s22, %s1665_s25  ;;  %p1670_p6 = scmp.lt.s32.totalorder %s64_s22, %s64_s22 }
  0x15   :  { %p1671_p7 = scmp.lt.s32.totalorder %s1669_s26, %s1665_s25 }
  0x17   :  { %p1672_p8 = por %p1671_p7, %p1670_p6 }
  0x19   :  { %p1673_p9 = pnand %p1672_p8, %p1666_p5 }
  0x1b   :  { %1676 = shalt.err (!%p1673_p9)
}
  0x1c   :  { %66 = dma.hbm_to_vmem [thread:$0]  %s1864_s4, 48, %s64_s22, [#allocation9]  }
  0x1d   :  { %s1685_s29 = scalar_lea.vmem %s28_s24, 64  ;;  %p1690_p11 = scmp.lt.s32.totalorder %s28_s24, %s28_s24 }
  0x1e   :  { %p1686_p10 = scmp.ne.s32.totalorder %s28_s24, %s1685_s29  ;;  %p1691_p12 = scmp.lt.s32.totalorder %s1685_s29, %s1685_s29 }
  0x20   :  { %p1692_p13 = por %p1691_p12, %p1690_p11 }
  0x22   :  { %p1693_p0 = pnand %p1692_p13, %p1686_p10 }
  0x24   :  { %1696 = shalt.err (!%p1693_p0)
}
  0x25   :  { %30 = dma.hbm_to_vmem [thread:$0]  %s1860_s0, 64, %s28_s24, [#allocation4]  }
  0x26   :  { %s1748_s12 = smov [#allocation7]  }
  0x27   :  { %s50_s13 = sshll.u32 %s1748_s12, 4  ;;  %s51_s13 = int_to_ptr.vmem [resolvable:$true] %s50_s13 }
  0x28   :  { %s1705_s14 = scalar_lea.vmem %s51_s13, 12288  ;;  %p1710_p2 = scmp.lt.s32.totalorder %s51_s13, %s51_s13 }
  0x29   :  { %p1706_p1 = scmp.ne.s32.totalorder %s51_s13, %s1705_s14  ;;  %p1711_p3 = scmp.lt.s32.totalorder %s1705_s14, %s1705_s14 }
  0x2b   :  { %p1712_p4 = por %p1711_p3, %p1710_p2 }
  0x2d   :  { %p1713_p5 = pnand %p1712_p4, %p1706_p1 }
  0x2f   :  { %1716 = shalt.err (!%p1713_p5)
}
  0x30   :  { %s1749_s4 = smov 192   ;;  %s1750_s15 = smov 12  }
  0x31   :  { %56 = dma.hbm_to_vmem [thread:$0]  %s1863_s3, 12288, %s51_s13, [#allocation6], %s1749_s4, %s1749_s4, %s1750_s15  }
  0x32   :  { %s1751_s18 = smov [#allocation10]  }
  0x33   :  { %s73_s7 = sshll.u32 %s1751_s18, 4  ;;  %s74_s7 = int_to_ptr.vmem [resolvable:$true] %s73_s7 }
  0x34   :  { %s1725_s0 = scalar_lea.vmem %s74_s7, 48  ;;  %s1729_s19 = scalar_lea.vmem %s74_s7, 64 }
  0x35   :  { %p1726_p6 = scmp.ne.s32.totalorder %s74_s7, %s1725_s0  ;;  %p1730_p7 = scmp.lt.s32.totalorder %s74_s7, %s74_s7 }
  0x36   :  { %p1731_p8 = scmp.lt.s32.totalorder %s1729_s19, %s1725_s0 }
  0x38   :  { %p1732_p9 = por %p1731_p8, %p1730_p7 }
  0x3a   :  { %p1733_p10 = pnand %p1732_p9, %p1726_p6 }
  0x3c   :  { %1736 = shalt.err (!%p1733_p10)
}
  0x3d   :  { %76 = dma.hbm_to_vmem [thread:$0]  %s1865_s5, 48, %s74_s7, [#allocation9]  }
  0x3e   :  { %1737 = dma.done.wait [#allocation4], 64  }
  0x3f   :  { %1738 = vsyncadd [#allocation4], 4294967232 }
  0x40   :  { %1739 = dma.done.wait [#allocation6], 16384  }
  0x41   :  { %1740 = vsyncadd [#allocation6], 4294950912 }
  0x42   :  { %1741 = dma.done.wait [#allocation9], 96  }
  0x43   :  { %1742 = vsyncadd [#allocation9], 4294967200  ;;  %v1752_v1 = vmov 0   ;;  %v1461_v2 = vld [vmem:[#allocation5 + $0xe4] ss:$16 sps:$4 sm:$0xff]   ;;  %vm1269_vm0 = vcmask 7168  }
  0x44   :  { %350 = vmatprep.mubr.bf16.mxu0 %v1752_v1  ;;  %391 = vmatprep.mubr.bf16.mxu1 %v1752_v1  ;;  %v1463_v3 = vld [vmem:[#allocation5 + $0xec] ss:$16 sps:$4 sm:$0xff]   ;;  %v1465_v4 = vld [vmem:[#allocation5 + $0xe0] ss:$16 sps:$4 sm:$0xff]   ;;  %v1466_v5 = vld [vmem:[#allocation5 + $0xe8] ss:$16 sps:$4 sm:$0xff]  }
  0x45   :  { %318 = vmatprep.subr.bf16.mxu0 %v1461_v2  ;;  %359 = vmatprep.subr.bf16.mxu1 %v1463_v3  ;;  %v1467_v6 = vld [vmem:[#allocation5 + $0xc4] ss:$16 sps:$4 sm:$0xff]   ;;  %v1469_v7 = vld [vmem:[#allocation5 + $0xcc] ss:$16 sps:$4 sm:$0xff]   ;;  %v1471_v8 = vld [vmem:[#allocation5 + $0xc0] ss:$16 sps:$4 sm:$0xff]  }
  0x46   :  { %319 = vmatpush1.bf16.msra.mxu0 %v1465_v4  ;;  %360 = vmatpush1.bf16.msra.mxu1 %v1466_v5  ;;  %v1472_v9 = vld [vmem:[#allocation5 + $0xc8] ss:$16 sps:$4 sm:$0xff]   ;;  %v1473_v10 = vld [vmem:[#allocation5 + $0xa4] ss:$16 sps:$4 sm:$0xff]   ;;  %v1475_v11 = vld [vmem:[#allocation5 + $0xac] ss:$16 sps:$4 sm:$0xff]  }
  0x47   :  { %320 = vmatprep.subr.bf16.mxu0 %v1467_v6  ;;  %361 = vmatprep.subr.bf16.mxu1 %v1469_v7  ;;  %v1477_v12 = vld [vmem:[#allocation5 + $0xa0] ss:$16 sps:$4 sm:$0xff]   ;;  %v1478_v13 = vld [vmem:[#allocation5 + $0xa8] ss:$16 sps:$4 sm:$0xff]   ;;  %v1479_v14 = vld [vmem:[#allocation5 + $0x84] ss:$16 sps:$4 sm:$0xff]  }
  0x48   :  { %v1481_v15 = vld [vmem:[#allocation5 + $0x8c] ss:$16 sps:$4 sm:$0xff]   ;;  %v1483_v16 = vld [vmem:[#allocation5 + $0x80] ss:$16 sps:$4 sm:$0xff]   ;;  %v1484_v17 = vld [vmem:[#allocation5 + $0x88] ss:$16 sps:$4 sm:$0xff]  }
  0x49   :  { %v1485_v18 = vld [vmem:[#allocation5 + $0x64] ss:$16 sps:$4 sm:$0xff]   ;;  %v1487_v19 = vld [vmem:[#allocation5 + $0x6c] ss:$16 sps:$4 sm:$0xff]   ;;  %v1489_v20 = vld [vmem:[#allocation5 + $0x60] ss:$16 sps:$4 sm:$0xff]  }
  0x4a   :  { %321 = vmatpush1.bf16.msra.mxu0 %v1471_v8  ;;  %362 = vmatpush1.bf16.msra.mxu1 %v1472_v9  ;;  %v1490_v21 = vld [vmem:[#allocation5 + $0x68] ss:$16 sps:$4 sm:$0xff]   ;;  %v1491_v22 = vld [vmem:[#allocation5 + $0x44] ss:$16 sps:$4 sm:$0xff]   ;;  %v1493_v23 = vld [vmem:[#allocation5 + $0x4c] ss:$16 sps:$4 sm:$0xff]  }
  0x4b   :  { %322 = vmatprep.subr.bf16.mxu0 %v1473_v10  ;;  %363 = vmatprep.subr.bf16.mxu1 %v1475_v11  ;;  %v1495_v24 = vld [vmem:[#allocation5 + $0x40] ss:$16 sps:$4 sm:$0xff]   ;;  %v1496_v25 = vld [vmem:[#allocation5 + $0x48] ss:$16 sps:$4 sm:$0xff]   ;;  %v1497_v26 = vld [vmem:[#allocation5 + $0x24] ss:$16 sps:$4 sm:$0xff]  }
  0x4c   :  { %v1499_v27 = vld [vmem:[#allocation5 + $0x2c] ss:$16 sps:$4 sm:$0xff]   ;;  %v1501_v28 = vld [vmem:[#allocation5 + $0x20] ss:$16 sps:$4 sm:$0xff]   ;;  %v1502_v29 = vld [vmem:[#allocation5 + $0x28] ss:$16 sps:$4 sm:$0xff]  }
  0x4d   :  { %v1503_v30 = vld [vmem:[#allocation5 + $0x4] ss:$16 sps:$4 sm:$0xff]   ;;  %v1505_v31 = vld [vmem:[#allocation5 + $0xc] ss:$16 sps:$4 sm:$0xff]   ;;  %v1507_v32 = vld [vmem:[#allocation5] ss:$16 sps:$4 sm:$0xff]  }
  0x4e   :  { %323 = vmatpush1.bf16.msra.mxu0 %v1477_v12  ;;  %364 = vmatpush1.bf16.msra.mxu1 %v1478_v13  ;;  %v1508_v33 = vld [vmem:[#allocation5 + $0x8] ss:$16 sps:$4 sm:$0xff]   ;;  %v103_v36 = vld [vmem:[#allocation3] sm:$0xf]  ;;  %v1517_v39 = vld [vmem:[#allocation7 + $0x94] ss:$12 sps:$4 sm:$0xff]  }
  0x4f   :  { %324 = vmatprep.subr.bf16.mxu0 %v1479_v14  ;;  %365 = vmatprep.subr.bf16.mxu1 %v1481_v15  ;;  %v1511_v34 = vld [vmem:[#allocation7 + $0xac] ss:$12 sps:$4 sm:$0xff]   ;;  %v1509_v37 = vld [vmem:[#allocation7 + $0xa8] ss:$12 sps:$4 sm:$0xff]   ;;  %v1515_v41 = vld [vmem:[#allocation7 + $0x90] ss:$12 sps:$4 sm:$0xff]  }
  0x50   :  { %v1514_v35 = vld [vmem:[#allocation7 + $0x22c] ss:$12 sps:$4 sm:$0xff]   ;;  %v1512_v38 = vld [vmem:[#allocation7 + $0x228] ss:$12 sps:$4 sm:$0xff]   ;;  %v1518_v42 = vld [vmem:[#allocation7 + $0x210] ss:$12 sps:$4 sm:$0xff]  }
  0x51   :  { %v1520_v40 = vld [vmem:[#allocation7 + $0x214] ss:$12 sps:$4 sm:$0xff]   ;;  %v1523_v43 = vld [vmem:[#allocation7 + $0x7c] ss:$12 sps:$4 sm:$0xff]   ;;  %v1521_v45 = vld [vmem:[#allocation7 + $0x78] ss:$12 sps:$4 sm:$0xff]  }
  0x52   :  { %325 = vmatpush1.bf16.msra.mxu0 %v1483_v16  ;;  %366 = vmatpush1.bf16.msra.mxu1 %v1484_v17  ;;  %v1526_v44 = vld [vmem:[#allocation7 + $0x1fc] ss:$12 sps:$4 sm:$0xff]   ;;  %v1524_v46 = vld [vmem:[#allocation7 + $0x1f8] ss:$12 sps:$4 sm:$0xff]   ;;  %v1527_v49 = vld [vmem:[#allocation7 + $0x60] ss:$12 sps:$4 sm:$0xff]  }
  0x53   :  { %326 = vmatprep.subr.bf16.mxu0 %v1485_v18  ;;  %367 = vmatprep.subr.bf16.mxu1 %v1487_v19  ;;  %v1529_v47 = vld [vmem:[#allocation7 + $0x64] ss:$12 sps:$4 sm:$0xff]   ;;  %v1530_v50 = vld [vmem:[#allocation7 + $0x1e0] ss:$12 sps:$4 sm:$0xff]   ;;  %v1533_v53 = vld [vmem:[#allocation7 + $0x48] ss:$12 sps:$4 sm:$0xff]  }
  0x54   :  { %v1532_v48 = vld [vmem:[#allocation7 + $0x1e4] ss:$12 sps:$4 sm:$0xff]   ;;  %v1535_v51 = vld [vmem:[#allocation7 + $0x4c] ss:$12 sps:$4 sm:$0xff]   ;;  %v1536_v54 = vld [vmem:[#allocation7 + $0x1c8] ss:$12 sps:$4 sm:$0xff]  }
  0x55   :  { %v1538_v52 = vld [vmem:[#allocation7 + $0x1cc] ss:$12 sps:$4 sm:$0xff]   ;;  %v1541_v55 = vld [vmem:[#allocation7 + $0x34] ss:$12 sps:$4 sm:$0xff]   ;;  %v1539_v57 = vld [vmem:[#allocation7 + $0x30] ss:$12 sps:$4 sm:$0xff]  }
  0x56   :  { %327 = vmatpush1.bf16.msra.mxu0 %v1489_v20  ;;  %368 = vmatpush1.bf16.msra.mxu1 %v1490_v21  ;;  %v1544_v56 = vld [vmem:[#allocation7 + $0x1b4] ss:$12 sps:$4 sm:$0xff]   ;;  %v1542_v58 = vld [vmem:[#allocation7 + $0x1b0] ss:$12 sps:$4 sm:$0xff]   ;;  %v1545_v61 = vld [vmem:[#allocation7 + $0x18] ss:$12 sps:$4 sm:$0xff]  }
  0x57   :  { %328 = vmatprep.subr.bf16.mxu0 %v1491_v22  ;;  %369 = vmatprep.subr.bf16.mxu1 %v1493_v23  ;;  %v1547_v59 = vld [vmem:[#allocation7 + $0x1c] ss:$12 sps:$4 sm:$0xff]   ;;  %v1548_v62 = vld [vmem:[#allocation7 + $0x198] ss:$12 sps:$4 sm:$0xff]   ;;  %v1551_v1 = vld [vmem:[#allocation7] ss:$12 sps:$4 sm:$0xff]  }
  0x58   :  { %v1550_v60 = vld [vmem:[#allocation7 + $0x19c] ss:$12 sps:$4 sm:$0xff]   ;;  %v1553_v63 = vld [vmem:[#allocation7 + $0x4] ss:$12 sps:$4 sm:$0xff]   ;;  %v1554_v2 = vld [vmem:[#allocation7 + $0x180] ss:$12 sps:$4 sm:$0xff]  }
  0x59   :  { %v1556_v0 = vld [vmem:[#allocation7 + $0x184] ss:$12 sps:$4 sm:$0xff]   ;;  %v1559_v3 = vld [vmem:[#allocation7 + $0x16c] ss:$12 sps:$4 sm:$0xff]   ;;  %v1557_v5 = vld [vmem:[#allocation7 + $0x168] ss:$12 sps:$4 sm:$0xff]  }
  0x5a   :  { %329 = vmatpush1.bf16.msra.mxu0 %v1495_v24  ;;  %370 = vmatpush1.bf16.msra.mxu1 %v1496_v25  ;;  %v1562_v4 = vld [vmem:[#allocation7 + $0x2ec] ss:$12 sps:$4 sm:$0xff]   ;;  %v1560_v6 = vld [vmem:[#allocation7 + $0x2e8] ss:$12 sps:$4 sm:$0xff]   ;;  %v1563_v9 = vld [vmem:[#allocation7 + $0x150] ss:$12 sps:$4 sm:$0xff]  }
  0x5b   :  { %330 = vmatprep.subr.bf16.mxu0 %v1497_v26  ;;  %371 = vmatprep.subr.bf16.mxu1 %v1499_v27  ;;  %v1565_v7 = vld [vmem:[#allocation7 + $0x154] ss:$12 sps:$4 sm:$0xff]   ;;  %v1566_v10 = vld [vmem:[#allocation7 + $0x2d0] ss:$12 sps:$4 sm:$0xff]   ;;  %v1569_v13 = vld [vmem:[#allocation7 + $0x138] ss:$12 sps:$4 sm:$0xff]  }
  0x5c   :  { %v1568_v8 = vld [vmem:[#allocation7 + $0x2d4] ss:$12 sps:$4 sm:$0xff]   ;;  %v1571_v11 = vld [vmem:[#allocation7 + $0x13c] ss:$12 sps:$4 sm:$0xff]   ;;  %v1572_v14 = vld [vmem:[#allocation7 + $0x2b8] ss:$12 sps:$4 sm:$0xff]  }
  0x5d   :  { %v1574_v12 = vld [vmem:[#allocation7 + $0x2bc] ss:$12 sps:$4 sm:$0xff]   ;;  %v1577_v15 = vld [vmem:[#allocation7 + $0x124] ss:$12 sps:$4 sm:$0xff]   ;;  %v1575_v17 = vld [vmem:[#allocation7 + $0x120] ss:$12 sps:$4 sm:$0xff]  }
  0x5e   :  { %331 = vmatpush1.bf16.msra.mxu0 %v1501_v28  ;;  %372 = vmatpush1.bf16.msra.mxu1 %v1502_v29  ;;  %v1580_v16 = vld [vmem:[#allocation7 + $0x2a4] ss:$12 sps:$4 sm:$0xff]   ;;  %v1578_v18 = vld [vmem:[#allocation7 + $0x2a0] ss:$12 sps:$4 sm:$0xff]   ;;  %v1581_v21 = vld [vmem:[#allocation7 + $0x108] ss:$12 sps:$4 sm:$0xff]  }
  0x5f   :  { %332 = vmatprep.subr.bf16.mxu0 %v1503_v30  ;;  %373 = vmatprep.subr.bf16.mxu1 %v1505_v31  ;;  %v1583_v19 = vld [vmem:[#allocation7 + $0x10c] ss:$12 sps:$4 sm:$0xff]   ;;  %v1584_v22 = vld [vmem:[#allocation7 + $0x288] ss:$12 sps:$4 sm:$0xff]   ;;  %v1587_v25 = vld [vmem:[#allocation7 + $0xf0] ss:$12 sps:$4 sm:$0xff]  }
  0x60   :  { %v1586_v20 = vld [vmem:[#allocation7 + $0x28c] ss:$12 sps:$4 sm:$0xff]   ;;  %v1589_v23 = vld [vmem:[#allocation7 + $0xf4] ss:$12 sps:$4 sm:$0xff]   ;;  %v1590_v26 = vld [vmem:[#allocation7 + $0x270] ss:$12 sps:$4 sm:$0xff]  }
  0x61   :  { %v1592_v24 = vld [vmem:[#allocation7 + $0x274] ss:$12 sps:$4 sm:$0xff]   ;;  %v1595_v27 = vld [vmem:[#allocation7 + $0xdc] ss:$12 sps:$4 sm:$0xff]   ;;  %v1593_v29 = vld [vmem:[#allocation7 + $0xd8] ss:$12 sps:$4 sm:$0xff]  }
  0x62   :  { %333 = vmatpush1.bf16.msra.mxu0 %v1507_v32  ;;  %374 = vmatpush1.bf16.msra.mxu1 %v1508_v33  ;;  %v1598_v28 = vld [vmem:[#allocation7 + $0x25c] ss:$12 sps:$4 sm:$0xff]   ;;  %v1596_v30 = vld [vmem:[#allocation7 + $0x258] ss:$12 sps:$4 sm:$0xff]   ;;  %v1599_v33 = vld [vmem:[#allocation7 + $0xc0] ss:$12 sps:$4 sm:$0xff]  }
  0x63   :  { %1069 = vmatprep.subr.bf16.mxu0 %v1511_v34  ;;  %1110 = vmatprep.subr.bf16.mxu1 %v1514_v35  ;;  %v1601_v31 = vld [vmem:[#allocation7 + $0xc4] ss:$12 sps:$4 sm:$0xff]   ;;  %v1602_v34 = vld [vmem:[#allocation7 + $0x240] ss:$12 sps:$4 sm:$0xff]  }
  0x64   :  { %v1604_v32 = vld [vmem:[#allocation7 + $0x244] ss:$12 sps:$4 sm:$0xff]  }
  0x65   :  { %351 = vmatmul.mubr.bf16.vlgmr.msra.gmra.mxu0 %v103_v36  ;;  %392 = vmatmul.mubr.bf16.vlgmr.msra.gmra.mxu1 %v103_v36  ;;  %v1605_v35 = vld [vmem:[#allocation7 + $0x170] ss:$12 sps:$4 sm:$0xff]  }
  0x66   :  { %1070 = vmatpush1.bf16.msra.mxu0 %v1509_v37  ;;  %1111 = vmatpush1.bf16.msra.mxu1 %v1512_v38  ;;  %v1606_v36 = vld [vmem:[#allocation7 + $0x2f0] ss:$12 sps:$4 sm:$0xff]   ;;  %v138_v37 = vlaneseq }
  0x67   :  { %1071 = vmatprep.subr.bf16.mxu0 %v1517_v39  ;;  %1112 = vmatprep.subr.bf16.mxu1 %v1520_v40 }
  0x68   :  { %v139_v38 = vshrl.u32 %v138_v37, 7  ;;  %v1636_v37 = vld [vmem:[#allocation7 + $0x188] ss:$12 sps:$4 sm:$0xff]  }
  0x6a   :  { %1072 = vmatpush1.bf16.msra.mxu0 %v1515_v41  ;;  %1113 = vmatpush1.bf16.msra.mxu1 %v1518_v42  ;;  %v1831_v39 = vsub.s32 0, %v139_v38  ;;  %v1833_v40 = vsub.s32 2, %v139_v38  ;;  %v136_v41 = vld [vmem:[%s1862_s2] sm:$0xf]  ;;  %v1838_v42 = vsub.s32 1, %v139_v38 }
  0x6b   :  { %1073 = vmatprep.subr.bf16.mxu0 %v1523_v43  ;;  %1114 = vmatprep.subr.bf16.mxu1 %v1526_v44  ;;  %v152_v43 = vsub.s32 3, %v139_v38 }
  0x6c   :  { %v141_v44 = vrot.slane %v136_v41, %v1831_v39 }
  0x6e   :  { %1074 = vmatpush1.bf16.msra.mxu0 %v1521_v45  ;;  %1115 = vmatpush1.bf16.msra.mxu1 %v1524_v46  ;;  %v149_v45 = vrot.slane %v136_v41, %v1833_v40  ;;  %v145_v46 = vrot.slane %v136_v41, %v1838_v42 }
  0x6f   :  { %1075 = vmatprep.subr.bf16.mxu0 %v1529_v47  ;;  %1116 = vmatprep.subr.bf16.mxu1 %v1532_v48  ;;  %v153_v47 = vrot.slane %v136_v41, %v152_v43 }
  0x72   :  { %1076 = vmatpush1.bf16.msra.mxu0 %v1527_v49  ;;  %1117 = vmatpush1.bf16.msra.mxu1 %v1530_v50 }
  0x73   :  { %1077 = vmatprep.subr.bf16.mxu0 %v1535_v51  ;;  %1118 = vmatprep.subr.bf16.mxu1 %v1538_v52 }
  0x76   :  { %1078 = vmatpush1.bf16.msra.mxu0 %v1533_v53  ;;  %1119 = vmatpush1.bf16.msra.mxu1 %v1536_v54 }
  0x77   :  { %1079 = vmatprep.subr.bf16.mxu0 %v1541_v55  ;;  %1120 = vmatprep.subr.bf16.mxu1 %v1544_v56 }
  0x7a   :  { %1080 = vmatpush1.bf16.msra.mxu0 %v1539_v57  ;;  %1121 = vmatpush1.bf16.msra.mxu1 %v1542_v58 }
  0x7b   :  { %1081 = vmatprep.subr.bf16.mxu0 %v1547_v59  ;;  %1122 = vmatprep.subr.bf16.mxu1 %v1550_v60 }
  0x7e   :  { %1082 = vmatpush1.bf16.msra.mxu0 %v1545_v61  ;;  %1123 = vmatpush1.bf16.msra.mxu1 %v1548_v62 }
  0x7f   :  { %1083 = vmatprep.subr.bf16.mxu0 %v1553_v63  ;;  %1124 = vmatprep.subr.bf16.mxu1 %v1556_v0 }
  0x82   :  { %1084 = vmatpush1.bf16.msra.mxu0 %v1551_v1  ;;  %1125 = vmatpush1.bf16.msra.mxu1 %v1554_v2 }
  0x83   :  { %1085 = vmatprep.subr.bf16.mxu0 %v1559_v3  ;;  %1126 = vmatprep.subr.bf16.mxu1 %v1562_v4 }
  0x86   :  { %1086 = vmatpush2.bf16.msra.mxu0 %v1557_v5  ;;  %1127 = vmatpush2.bf16.msra.mxu1 %v1560_v6  ;;  %v1607_v6 = vld [vmem:[#allocation7 + $0xb0] ss:$12 sps:$4 sm:$0xff]  }
  0x87   :  { %1087 = vmatprep.subr.bf16.mxu0 %v1565_v7  ;;  %1128 = vmatprep.subr.bf16.mxu1 %v1568_v8  ;;  %v1608_v7 = vld [vmem:[#allocation7 + $0x230] ss:$12 sps:$4 sm:$0xff]  }
  0x8a   :  { %1088 = vmatpush2.bf16.msra.mxu0 %v1563_v9  ;;  %1129 = vmatpush2.bf16.msra.mxu1 %v1566_v10  ;;  %v1609_v10 = vld [vmem:[#allocation7 + $0x158] ss:$12 sps:$4 sm:$0xff]  }
  0x8b   :  { %1089 = vmatprep.subr.bf16.mxu0 %v1571_v11  ;;  %1130 = vmatprep.subr.bf16.mxu1 %v1574_v12  ;;  %v1610_v11 = vld [vmem:[#allocation7 + $0x2d8] ss:$12 sps:$4 sm:$0xff]  }
  0x8c   :  { %v1611_v12 = vld [vmem:[#allocation7 + $0x98] ss:$12 sps:$4 sm:$0xff]  }
  0x8e   :  { %1090 = vmatpush2.bf16.msra.mxu0 %v1569_v13  ;;  %1131 = vmatpush2.bf16.msra.mxu1 %v1572_v14  ;;  %v1612_v13 = vld [vmem:[#allocation7 + $0x218] ss:$12 sps:$4 sm:$0xff]   ;;  %v1613_v14 = vld [vmem:[#allocation7 + $0x140] ss:$12 sps:$4 sm:$0xff]  }
  0x8f   :  { %1091 = vmatprep.subr.bf16.mxu0 %v1577_v15  ;;  %1132 = vmatprep.subr.bf16.mxu1 %v1580_v16  ;;  %v1614_v15 = vld [vmem:[#allocation7 + $0x2c0] ss:$12 sps:$4 sm:$0xff]  }
  0x90   :  { %v1615_v16 = vld [vmem:[#allocation7 + $0x80] ss:$12 sps:$4 sm:$0xff]  }
  0x92   :  { %1092 = vmatpush2.bf16.msra.mxu0 %v1575_v17  ;;  %1133 = vmatpush2.bf16.msra.mxu1 %v1578_v18  ;;  %v1616_v17 = vld [vmem:[#allocation7 + $0x200] ss:$12 sps:$4 sm:$0xff]   ;;  %v1617_v18 = vld [vmem:[#allocation7 + $0x128] ss:$12 sps:$4 sm:$0xff]  }
  0x93   :  { %1093 = vmatprep.subr.bf16.mxu0 %v1583_v19  ;;  %1134 = vmatprep.subr.bf16.mxu1 %v1586_v20  ;;  %v1618_v19 = vld [vmem:[#allocation7 + $0x2a8] ss:$12 sps:$4 sm:$0xff]  }
  0x94   :  { %v1619_v20 = vld [vmem:[#allocation7 + $0x68] ss:$12 sps:$4 sm:$0xff]  }
  0x96   :  { %1094 = vmatpush2.bf16.msra.mxu0 %v1581_v21  ;;  %1135 = vmatpush2.bf16.msra.mxu1 %v1584_v22  ;;  %v1620_v21 = vld [vmem:[#allocation7 + $0x1e8] ss:$12 sps:$4 sm:$0xff]   ;;  %v1621_v22 = vld [vmem:[#allocation7 + $0x110] ss:$12 sps:$4 sm:$0xff]  }
  0x97   :  { %1095 = vmatprep.subr.bf16.mxu0 %v1589_v23  ;;  %1136 = vmatprep.subr.bf16.mxu1 %v1592_v24  ;;  %v1622_v23 = vld [vmem:[#allocation7 + $0x290] ss:$12 sps:$4 sm:$0xff]  }
  0x98   :  { %v1623_v24 = vld [vmem:[#allocation7 + $0x50] ss:$12 sps:$4 sm:$0xff]  }
  0x9a   :  { %1096 = vmatpush2.bf16.msra.mxu0 %v1587_v25  ;;  %1137 = vmatpush2.bf16.msra.mxu1 %v1590_v26  ;;  %v1624_v25 = vld [vmem:[#allocation7 + $0x1d0] ss:$12 sps:$4 sm:$0xff]   ;;  %v1625_v26 = vld [vmem:[#allocation7 + $0xf8] ss:$12 sps:$4 sm:$0xff]  }
  0x9b   :  { %1097 = vmatprep.subr.bf16.mxu0 %v1595_v27  ;;  %1138 = vmatprep.subr.bf16.mxu1 %v1598_v28  ;;  %v1626_v27 = vld [vmem:[#allocation7 + $0x278] ss:$12 sps:$4 sm:$0xff]  }
  0x9c   :  { %v1627_v28 = vld [vmem:[#allocation7 + $0x38] ss:$12 sps:$4 sm:$0xff]  }
  0x9e   :  { %1098 = vmatpush2.bf16.msra.mxu0 %v1593_v29  ;;  %1139 = vmatpush2.bf16.msra.mxu1 %v1596_v30  ;;  %v1628_v29 = vld [vmem:[#allocation7 + $0x1b8] ss:$12 sps:$4 sm:$0xff]   ;;  %v1629_v30 = vld [vmem:[#allocation7 + $0xe0] ss:$12 sps:$4 sm:$0xff]  }
  0x9f   :  { %1099 = vmatprep.subr.bf16.mxu0 %v1601_v31  ;;  %1140 = vmatprep.subr.bf16.mxu1 %v1604_v32  ;;  %v1630_v31 = vld [vmem:[#allocation7 + $0x260] ss:$12 sps:$4 sm:$0xff]  }
  0xa0   :  { %v1631_v32 = vld [vmem:[#allocation7 + $0x20] ss:$12 sps:$4 sm:$0xff]  }
  0xa2   :  { %1100 = vmatpush2.bf16.msra.mxu0 %v1599_v33  ;;  %1141 = vmatpush2.bf16.msra.mxu1 %v1602_v34  ;;  %v1632_v33 = vld [vmem:[#allocation7 + $0x1a0] ss:$12 sps:$4 sm:$0xff]   ;;  %v1633_v34 = vld [vmem:[#allocation7 + $0xc8] ss:$12 sps:$4 sm:$0xff]  }
  0xa3   :  { %1407 = vmatprep.subr.bf16.mxu0 %v1605_v35  ;;  %1429 = vmatprep.subr.bf16.mxu1 %v1606_v36  ;;  %v1634_v35 = vld [vmem:[#allocation7 + $0x248] ss:$12 sps:$4 sm:$0xff]  }
  0xa4   :  { %v1635_v36 = vld [vmem:[#allocation7 + $0x8] ss:$12 sps:$4 sm:$0xff]  }
 0x125   :  { %v352_v48 = vpop.f32.mrf.mxu0  ;;  %v393_v49 = vpop.f32.mrf.mxu1 }
 0x126   :  { %v353_v50 = vadd.f32 %v352_v48, %v141_v44  ;;  %v394_v51 = vadd.f32 %v393_v49, %v149_v45  ;;  %v540_v49 = vld [vmem:[#allocation8] sm:$0x7] }
 0x127   :  { %v354_v52 = vpop.f32.mrf.mxu0  ;;  %v395_v53 = vpop.f32.mrf.mxu1 }
 0x128   :  { %v400_v54 = vmul.f32 0.01, %v353_v50  ;;  %v402_v55 = vmul.f32 0.01, %v394_v51  ;;  %v355_v56 = vadd.f32 %v354_v52, %v145_v46  ;;  %v396_v57 = vadd.f32 %v395_v53, %v153_v47 }
 0x129   :  { %v356_v58 = vpop.f32.mrf.mxu0  ;;  %v397_v59 = vpop.f32.mrf.mxu1 }
 0x12a   :  { %v401_v60 = vmul.f32 0.01, %v355_v56  ;;  %v403_v61 = vmul.f32 0.01, %v396_v57  ;;  %v404_v62 = vmax.f32 %v353_v50, %v400_v54  ;;  %v406_v63 = vmax.f32 %v394_v51, %v402_v55 }
 0x12b   :  { %v357_v0 = vpop.f32.mrf.mxu0  ;;  %v398_v1 = vpop.f32.mrf.mxu1  ;;  %v549_v50 = vrot.slane %v540_v49, %v1838_v42  ;;  %v545_v51 = vrot.slane %v540_v49, %v1831_v39  ;;  %v553_v59 = vrot.slane %v540_v49, %v1833_v40 }
 0x12c   :  { %v405_v2 = vmax.f32 %v355_v56, %v401_v60  ;;  %v407_v3 = vmax.f32 %v396_v57, %v403_v61  ;;  %v1843_v8 = vpack.c.bf16 %v404_v62, %v404_v62  ;;  %v1845_v9 = vpack.c.bf16 %v406_v63, %v406_v63 }
 0x12e   :  { %v409_v4 = vpack.c.bf16 %v405_v2, %v405_v2  ;;  %v411_v5 = vpack.c.bf16 %v407_v3, %v407_v3  ;;  %v1237_v2 = vld [vmem:[#allocation10] sm:$0x7] }
 0x130   :  { %1101 = vmatprep.mubr.bf16.mxu0 %v409_v4  ;;  %1142 = vmatprep.mubr.bf16.mxu1 %v411_v5 }
 0x131   :  { %1102 = vmatmul.mubr.bf16.vlgmr.msra.gmra.mxu0 %v1843_v8  ;;  %1143 = vmatmul.mubr.bf16.vlgmr.msra.gmra.mxu1 %v1845_v9 }
 0x132   :  { %1408 = vmatpush3.bf16.msra.mxu0 %v1607_v6  ;;  %1430 = vmatpush3.bf16.msra.mxu1 %v1608_v7  ;;  %v1246_v6 = vrot.slane %v1237_v2, %v1838_v42 }
 0x133   :  { %1183 = vmatprep.mubr.bf16.mxu0 %v409_v4  ;;  %1223 = vmatprep.mubr.bf16.mxu1 %v411_v5 }
 0x134   :  { %1409 = vmatprep.subr.bf16.mxu0 %v1609_v10  ;;  %1431 = vmatprep.subr.bf16.mxu1 %v1610_v11  ;;  %v1242_v11 = vrot.slane %v1237_v2, %v1831_v39 }
 0x136   :  { %1410 = vmatpush3.bf16.msra.mxu0 %v1611_v12  ;;  %1432 = vmatpush3.bf16.msra.mxu1 %v1612_v13  ;;  %v1250_v13 = vrot.slane %v1237_v2, %v1833_v40 }
 0x137   :  { %1411 = vmatprep.subr.bf16.mxu0 %v1613_v14  ;;  %1433 = vmatprep.subr.bf16.mxu1 %v1614_v15 }
 0x13a   :  { %1412 = vmatpush3.bf16.msra.mxu0 %v1615_v16  ;;  %1434 = vmatpush3.bf16.msra.mxu1 %v1616_v17 }
 0x13b   :  { %1413 = vmatprep.subr.bf16.mxu0 %v1617_v18  ;;  %1435 = vmatprep.subr.bf16.mxu1 %v1618_v19 }
 0x13e   :  { %1414 = vmatpush3.bf16.msra.mxu0 %v1619_v20  ;;  %1436 = vmatpush3.bf16.msra.mxu1 %v1620_v21  ;;  %v1406_v20 = vld [vmem:[#allocation2] ss:$0 sm:$0xff] }
 0x13f   :  { %1415 = vmatprep.subr.bf16.mxu0 %v1621_v22  ;;  %1437 = vmatprep.subr.bf16.mxu1 %v1622_v23 }
 0x142   :  { %1416 = vmatpush3.bf16.msra.mxu0 %v1623_v24  ;;  %1438 = vmatpush3.bf16.msra.mxu1 %v1624_v25 }
 0x143   :  { %1417 = vmatprep.subr.bf16.mxu0 %v1625_v26  ;;  %1439 = vmatprep.subr.bf16.mxu1 %v1626_v27 }
 0x146   :  { %1418 = vmatpush3.bf16.msra.mxu0 %v1627_v28  ;;  %1440 = vmatpush3.bf16.msra.mxu1 %v1628_v29 }
 0x147   :  { %1419 = vmatprep.subr.bf16.mxu0 %v1629_v30  ;;  %1441 = vmatprep.subr.bf16.mxu1 %v1630_v31 }
 0x14a   :  { %1420 = vmatpush3.bf16.msra.mxu0 %v1631_v32  ;;  %1442 = vmatpush3.bf16.msra.mxu1 %v1632_v33 }
 0x14b   :  { %1421 = vmatprep.subr.bf16.mxu0 %v1633_v34  ;;  %1443 = vmatprep.subr.bf16.mxu1 %v1634_v35 }
 0x14e   :  { %1422 = vmatpush3.bf16.msra.mxu0 %v1635_v36  ;;  %1444 = vmatpush3.bf16.msra.mxu1 %v1636_v37 }
 0x151   :  { %1184 = vmatmul.mubr.bf16.vlgmr.msra.gmra.mxu0 %v1843_v8  ;;  %1224 = vmatmul.mubr.bf16.vlgmr.msra.gmra.mxu1 %v1845_v9 }
 0x1f1   :  { %v1103_v38 = vpop.f32.mrf.mxu0  ;;  %v1144_v41 = vpop.f32.mrf.mxu1 }
 0x1f2   :  { %v1104_v53 = vadd.f32 %v1103_v38, %v545_v51 }
 0x1f3   :  { %v1105_v43 = vpop.f32.mrf.mxu0  ;;  %v1146_v44 = vpop.f32.mrf.mxu1 }
 0x1f4   :  { %v1106_v52 = vadd.f32 %v1105_v43, %v549_v50  ;;  %v1145_v55 = vadd.f32 %v1144_v41, %v1104_v53 }
 0x1f5   :  { %v1107_v45 = vpop.f32.mrf.mxu0  ;;  %v1148_v46 = vpop.f32.mrf.mxu1 }
 0x1f6   :  { %v1147_v54 = vadd.f32 %v1146_v44, %v1106_v52  ;;  %v1231_v62 = vmul.f32 0.01, %v1145_v55 }
 0x1f7   :  { %v1108_v47 = vpop.f32.mrf.mxu0  ;;  %v1149_v48 = vpop.f32.mrf.mxu1 }
 0x1f8   :  { %v1232_v58 = vmul.f32 0.01, %v1147_v54  ;;  %v1234_v9 = vmax.f32 %v1145_v55, %v1231_v62 }
 0x1fa   :  { %v1235_v3 = vmax.f32 %v1147_v54, %v1232_v58  ;;  %v1254_v16 = vmul.f32 %v1242_v11, %v1234_v9 }
 0x1fc   :  { %v1255_v14 = vmul.f32 %v1246_v6, %v1235_v3 }
 0x1fe   :  { %v1257_v18 = vadd.f32 %v1255_v14, %v1254_v16 }
 0x211   :  { %v1423_v56 = vpop.f32.mrf.mxu0  ;;  %v1445_v57 = vpop.f32.mrf.mxu1 }
 0x213   :  { %v1424_v60 = vpop.f32.mrf.mxu0  ;;  %v1446_v61 = vpop.f32.mrf.mxu1 }
 0x214   :  { %v1425_v63 = vadd.f32 %v1424_v60, %v1423_v56  ;;  %v1447_v5 = vadd.f32 %v1446_v61, %v1445_v57 }
 0x215   :  { %v1426_v0 = vpop.f32.mrf.mxu0  ;;  %v1448_v1 = vpop.f32.mrf.mxu1 }
 0x216   :  { %v1186_v4 = vadd.f32 %v1425_v63, %v553_v59 }
 0x217   :  { %v1427_v7 = vpop.f32.mrf.mxu0  ;;  %v1449_v8 = vpop.f32.mrf.mxu1 }
 0x218   :  { %v1226_v10 = vadd.f32 %v1447_v5, %v1186_v4 }
 0x21a   :  { %v1233_v12 = vmul.f32 0.01, %v1226_v10 }
 0x21c   :  { %v1236_v15 = vmax.f32 %v1226_v10, %v1233_v12 }
 0x21e   :  { %v1256_v17 = vmul.f32 %v1250_v13, %v1236_v15 }
 0x220   :  { %v1258_v19 = vadd.f32 %v1257_v18, %v1256_v17 }
 0x222   :  { %1259 = vadd.xlane.f32.xlu0 %v1258_v19 }
 0x2ab   :  { %v1260_v21 = vpop.xlane.xlu0 %1259 }
 0x2ac   :  { %v1268_v42 = vadd.f32 %v1406_v20, %v1260_v21 }
 0x2ae   :  { %1270 = vst.msk [vmem:[%s1871_s11] sm:$0xff] %vm1269_vm0, %v1268_v42 }
 0x2af   :  { %1275 = vsyncpa [#allocation4], 1 }
 0x2b0   :  { %1276 = vsyncpa [#allocation6], 1 }
 0x2b1   :  { %1277 = vsyncpa [#allocation9], 1 }

</bundles_post_ra>
